<compile_context>
chip_gen: v6e
topology: v6e:2x2x1
jax: 0.10.0
libtpu: 0.0.40
codegen_flags: <defaults>
</compile_context>

<pallas_src>
import functools

import jax
import jax.numpy as jnp
from jax.experimental import pallas as pl
from jax.experimental.pallas import tpu as pltpu

LANES = 128
SUBLANES = 8
MAX_BLOCK_ROWS = 8192   # (8192, 128) f32 = 4 MiB/block; 2 inputs x 2 buffers = 16 MiB VMEM


def _round_up(x, m):
    return ((x + m - 1) // m) * m


def _int_pow(u, gi):
    # Static small integer power via repeated multiply (avoids pow on the EUP).
    if gi == 0:
        return jnp.ones_like(u)
    w = u
    for _ in range(gi - 1):
        w = w * u
    return w


def _focal_terms(x, y, gamma):
    # Per-element focal term (without alpha); used for the <128-element remainder + reference.
    bce = jnp.maximum(x, 0.0) - x * y + jnp.log1p(jnp.exp(-jnp.abs(x)))
    pt = jnp.exp(-bce)
    return (1.0 - pt) ** gamma * bce


def _focal_loss_kernel(pred_ref, targ_ref, out_ref, acc_ref, *,
                       gamma, binary_targets, tail_valid, block_rows):
    o = pl.program_id(0)
    i = pl.program_id(1)
    n_inner = pl.num_programs(1)

    @pl.when(i == 0)
    def _():
        acc_ref[...] = jnp.zeros_like(acc_ref)

    x = pred_ref[...].astype(jnp.float32)
    y = targ_ref[...].astype(jnp.float32)

    # Numerically-stable BCE with logits (== F.binary_cross_entropy_with_logits):
    #   bce = max(x, 0) - x*y + log1p(exp(-|x|))
    e = jnp.exp(-jnp.abs(x))
    bce = jnp.maximum(x, 0.0) - x * y + jnp.log1p(e)

    if binary_targets:
        # pt = exp(-bce) == sigmoid(x*(2y-1)) for y in {0,1}; reuse e = exp(-|x|) instead of a
        # second exp — keeps the single EUP off the critical path at v7x HBM rates.
        z = x * (2.0 * y - 1.0)
        pt = jnp.where(z >= 0.0, 1.0, e) / (1.0 + e)
    else:
        pt = jnp.exp(-bce)

    u = 1.0 - pt
    g = float(gamma)
    if g.is_integer() and 0 <= int(g) <= 8:
        w = _int_pow(u, int(g))            # gamma=2 -> u*u, no transcendentals
    else:
        w = u ** g                          # non-integer gamma fallback
    focal = w * bce                         # alpha and 1/N applied once in the wrapper

    groups = block_rows // SUBLANES
    block_elems = block_rows * LANES

    def _fold(v):
        # (block_rows, 128) -> (8, 128): pure vreg+vreg adds on the VPU, no cross-lane work.
        return jnp.sum(v.reshape(groups, SUBLANES, LANES), axis=0)

    if tail_valid < block_elems:
        # Only the global last block can contain clipped / out-of-range rows.
        is_tail = jnp.logical_and(o == pl.num_programs(0) - 1, i == n_inner - 1)

        @pl.when(is_tail)
        def _():
            r = jax.lax.broadcasted_iota(jnp.int32, focal.shape, 0)
            c = jax.lax.broadcasted_iota(jnp.int32, focal.shape, 1)
            lidx = r * LANES + c            # block-local index, fits int32
            # where-select (not multiply-by-mask) so NaN/Inf from garbage rows is discarded.
            acc_ref[...] += _fold(jnp.where(lidx < tail_valid, focal, 0.0))

        @pl.when(jnp.logical_not(is_tail))
        def _():
            acc_ref[...] += _fold(focal)
    else:
        acc_ref[...] += _fold(focal)

    @pl.when(i == n_inner - 1)
    def _():
        out_ref[0, 0] = jnp.sum(acc_ref[...])


def focal_loss_pallas(pred, target, alpha=1.0, gamma=2.0, binary_targets=False):
    assert pred.shape == target.shape
    n_valid = int(pred.size)
    assert n_valid > 0

    # Stream f32 / bf16 inputs in their native dtype (bf16 halves HBM bytes); upcast otherwise.
    def _flat(a):
        a = a.reshape(-1)
        if a.dtype not in (jnp.float32, jnp.bfloat16):
            a = a.astype(jnp.float32)
        return a

    flat_p = _flat(pred)
    flat_t = _flat(target)
    sub = 16 if (flat_p.dtype == jnp.bfloat16 or flat_t.dtype == jnp.bfloat16) else SUBLANES

    # Lane-aligned prefix goes through the kernel; a <128-element remainder (rare) is a tiny
    # jnp epilogue — no full-array jnp.pad HBM copy on either path.
    n_main = (n_valid // LANES) * LANES
    rem_sum = jnp.float32(0.0)
    if n_main < n_valid:
        xr = jax.lax.slice(flat_p, (n_main,), (n_valid,)).astype(jnp.float32)
        yr = jax.lax.slice(flat_t, (n_main,), (n_valid,)).astype(jnp.float32)
        rem_sum = jnp.sum(_focal_terms(xr, yr, float(gamma)))
        flat_p = jax.lax.slice(flat_p, (0,), (n_main,))
        flat_t = jax.lax.slice(flat_t, (0,), (n_main,))
    if n_main == 0:
        return rem_sum * (float(alpha) / float(n_valid))

    rows = n_main // LANES
    p2d = flat_p.reshape(rows, LANES)
    t2d = flat_t.reshape(rows, LANES)

    # Block sizing: as large as the VMEM budget allows, rounded to the dtype sublane tile, and
    # chosen so the block count is even whenever the array spans >1 block (keeps the 2-way
    # TensorCore split from silently collapsing to one core on multi-TC chips).
    if rows <= MAX_BLOCK_ROWS:
        block_rows = max(_round_up(rows, sub), sub)
    else:
        n_blocks_tgt = pl.cdiv(rows, MAX_BLOCK_ROWS)
        if n_blocks_tgt % 2:
            n_blocks_tgt += 1
        block_rows = _round_up(pl.cdiv(rows, n_blocks_tgt), sub)
    block_elems = block_rows * LANES
    n_blocks = pl.cdiv(rows, block_rows)

    n_outer = 2 if (n_blocks >= 2 and n_blocks % 2 == 0) else 1
    n_inner = n_blocks // n_outer

    tail_valid = n_main - (n_blocks - 1) * block_elems   # valid elems in the global last block

    kernel = functools.partial(
        _focal_loss_kernel,
        gamma=float(gamma),
        binary_targets=bool(binary_targets),
        tail_valid=int(tail_valid),
        block_rows=int(block_rows),
    )

    partials = pl.pallas_call(
        kernel,
        out_shape=jax.ShapeDtypeStruct((n_outer, 1), jnp.float32),
        grid_spec=pltpu.PrefetchScalarGridSpec(
            num_scalar_prefetch=0,
            grid=(n_outer, n_inner),
            in_specs=[
                pl.BlockSpec((block_rows, LANES), lambda o, i: (o * n_inner + i, 0)),
                pl.BlockSpec((block_rows, LANES), lambda o, i: (o * n_inner + i, 0)),
            ],
            out_specs=pl.BlockSpec((1, 1), lambda o, i: (o, 0),
                                   memory_space=pltpu.SMEM),
            scratch_shapes=[pltpu.VMEM((SUBLANES, LANES), jnp.float32)],
        ),
        compiler_params=pltpu.CompilerParams(
            # "parallel" lets multi-TC chips shard the outer axis; no-op on 1-TC v5e/v6e.
            # (pltpu.CORE_PARALLEL is a v7x-only variant worth trying with an xprof trace.)
            dimension_semantics=("parallel", "arbitrary"),
            vmem_limit_bytes=32 << 20),
    )(p2d, t2d)

    return (jnp.sum(partials) + rem_sum) * (float(alpha) / float(n_valid))


def focal_loss_ref(pred, target, alpha=1.0, gamma=2.0):
    x = pred.astype(jnp.float32)
    y = target.astype(jnp.float32)
    return alpha * jnp.mean(_focal_terms(x, y, float(gamma)))


if __name__ == "__main__":
    key = jax.random.PRNGKey(0)
    k1, k2 = jax.random.split(key)
    # NCHW-shaped logits and targets (targets in [0, 1] as BCE-with-logits expects).
    pred = jax.random.normal(k1, (2, 4, 16, 16), dtype=jnp.float32)
    target = (jax.random.uniform(k2, (2, 4, 16, 16)) > 0.5).astype(jnp.float32)

    ref = focal_loss_ref(pred, target, alpha=1.0, gamma=2.0)

    # Default (soft-target-safe) path.
    out = focal_loss_pallas(pred, target, alpha=1.0, gamma=2.0)
    jax.block_until_ready(out)
    assert jnp.allclose(out, ref, rtol=1e-5, atol=1e-6), (out, ref)

    # Binary-target fast path (one fewer EUP transcendental; exact for 0/1 targets).
    out_b = focal_loss_pallas(pred, target, alpha=1.0, gamma=2.0, binary_targets=True)
    jax.block_until_ready(out_b)
    assert jnp.allclose(out_b, ref, rtol=1e-5, atol=1e-6), (out_b, ref)

    # bf16 streaming path (half the HBM bytes; upcast to f32 inside the kernel).
    pred_bf = pred.astype(jnp.bfloat16)
    targ_bf = target.astype(jnp.bfloat16)
    out_bf = focal_loss_pallas(pred_bf, targ_bf, alpha=1.0, gamma=2.0)
    jax.block_until_ready(out_bf)
    ref_bf = focal_loss_ref(pred_bf.astype(jnp.float32), targ_bf.astype(jnp.float32))
    assert jnp.allclose(out_bf, ref_bf, rtol=1e-5, atol=1e-6), (out_bf, ref_bf)

    print("KERNEL_OK")
</pallas_src>

<mosaic_0001>
module attributes {stable_mosaic.version = 11 : i64} {
  func.func @_focal_loss_kernel(%arg0: i32, %arg1: i32, %arg2: memref<16x128xf32, #tpu.memory_space<vmem>>, %arg3: memref<16x128xf32, #tpu.memory_space<vmem>>, %arg4: memref<1x1xf32, #tpu.memory_space<smem>>, %arg5: memref<8x128xf32, #tpu.memory_space<vmem>>) attributes {dimension_semantics = [#tpu.dimension_semantics<parallel>, #tpu.dimension_semantics<arbitrary>], iteration_bounds = array<i64: 1, 1>, scalar_prefetch = 0 : i64, scratch_operands = 1 : i64, tpu.core_type = #tpu.core_type<tc>, window_params = [{transform_indices = @transform_0, window_bounds = array<i64: 16, 128>}, {transform_indices = @transform_1, window_bounds = array<i64: 16, 128>}, {transform_indices = @transform_2, window_bounds = array<i64: 1, 1>}]} {
    %c0_i32 = arith.constant 0 : i32
    %0 = arith.cmpi eq, %arg1, %c0_i32 : i32
    %1 = arith.extui %0 : i1 to i32
    %c0_i32_0 = arith.constant 0 : i32
    %2 = arith.cmpi ne, %1, %c0_i32_0 : i32
    scf.if %2 {
      %cst_14 = arith.constant 0.000000e+00 : f32
      %30 = vector.broadcast %cst_14 : f32 to vector<8x128xf32>
      %c0_15 = arith.constant 0 : index
      %c0_16 = arith.constant 0 : index
      %31 = vector.load %arg5[%c0_15, %c0_16] : memref<8x128xf32, #tpu.memory_space<vmem>>, vector<8x128xf32>
      tpu.vector_store %arg5[%c0_15, %c0_16], %30 {strides = array<i32>} : memref<8x128xf32, #tpu.memory_space<vmem>>, vector<8x128xf32>,
    } else {
    }
    %c0 = arith.constant 0 : index
    %c0_1 = arith.constant 0 : index
    %3 = vector.load %arg2[%c0, %c0_1] : memref<16x128xf32, #tpu.memory_space<vmem>>, vector<16x128xf32>
    %c0_2 = arith.constant 0 : index
    %c0_3 = arith.constant 0 : index
    %4 = vector.load %arg3[%c0_2, %c0_3] : memref<16x128xf32, #tpu.memory_space<vmem>>, vector<16x128xf32>
    %5 = math.absf %3 : vector<16x128xf32>
    %cst = arith.constant 0.000000e+00 : f32
    %6 = vector.broadcast %cst : f32 to vector<16x128xf32>
    %7 = arith.subf %6, %5 : vector<16x128xf32>
    %8 = math.exp %7 : vector<16x128xf32>
    %cst_4 = arith.constant 0.000000e+00 : f32
    %9 = vector.broadcast %cst_4 : f32 to vector<16x128xf32>
    %10 = arith.maximumf %3, %9 : vector<16x128xf32>
    %11 = arith.mulf %3, %4 : vector<16x128xf32>
    %12 = arith.subf %10, %11 : vector<16x128xf32>
    %13 = math.log1p %8 : vector<16x128xf32>
    %14 = arith.addf %12, %13 : vector<16x128xf32>
    %cst_5 = arith.constant 0.000000e+00 : f32
    %15 = vector.broadcast %cst_5 : f32 to vector<16x128xf32>
    %16 = arith.subf %15, %14 : vector<16x128xf32>
    %17 = math.exp %16 : vector<16x128xf32>
    %cst_6 = arith.constant 1.000000e+00 : f32
    %18 = vector.broadcast %cst_6 : f32 to vector<16x128xf32>
    %19 = arith.subf %18, %17 : vector<16x128xf32>
    %20 = arith.mulf %19, %19 : vector<16x128xf32>
    %21 = arith.mulf %20, %14 : vector<16x128xf32>
    %c0_7 = arith.constant 0 : index
    %c0_8 = arith.constant 0 : index
    %22 = vector.load %arg5[%c0_7, %c0_8] : memref<8x128xf32, #tpu.memory_space<vmem>>, vector<8x128xf32>
    %23 = vector.shape_cast %21 : vector<16x128xf32> to vector<2x8x128xf32>
    %cst_9 = arith.constant dense<0.000000e+00> : vector<8x128xf32>
    %24 = vector.multi_reduction <add>, %23, %cst_9 [0] : vector<2x8x128xf32> to vector<8x128xf32>
    %25 = arith.addf %22, %24 : vector<8x128xf32>
    %c0_10 = arith.constant 0 : index
    %c0_11 = arith.constant 0 : index
    %26 = vector.load %arg5[%c0_10, %c0_11] : memref<8x128xf32, #tpu.memory_space<vmem>>, vector<8x128xf32>
    tpu.vector_store %arg5[%c0_10, %c0_11], %25 {strides = array<i32>} : memref<8x128xf32, #tpu.memory_space<vmem>>, vector<8x128xf32>,
    %c0_i32_12 = arith.constant 0 : i32
    %27 = arith.cmpi eq, %arg1, %c0_i32_12 : i32
    %28 = arith.extui %27 : i1 to i32
    %c0_i32_13 = arith.constant 0 : i32
    %29 = arith.cmpi ne, %28, %c0_i32_13 : i32
    scf.if %29 {
      %c0_14 = arith.constant 0 : index
      %c0_15 = arith.constant 0 : index
      %30 = vector.load %arg5[%c0_14, %c0_15] : memref<8x128xf32, #tpu.memory_space<vmem>>, vector<8x128xf32>
      %31 = vector.shape_cast %30 : vector<8x128xf32> to vector<1x8x128xf32>
      %cst_16 = arith.constant dense<0.000000e+00> : vector<1xf32>
      %32 = vector.multi_reduction <add>, %31, %cst_16 [1, 2] : vector<1x8x128xf32> to vector<1xf32>
      %33 = vector.shape_cast %32 : vector<1xf32> to vector<1x1x1xf32>
      %34 = vector.extract %33[0, 0, 0] : f32 from vector<1x1x1xf32>
      %c0_17 = arith.constant 0 : index
      %c0_18 = arith.constant 0 : index
      %35 = memref.load %arg4[%c0_17, %c0_18] : memref<1x1xf32, #tpu.memory_space<smem>>
      memref.store %34, %arg4[%c0_17, %c0_18] : memref<1x1xf32, #tpu.memory_space<smem>>
    } else {
    }
    return
  }
  func.func @transform_0(%arg0: i32, %arg1: i32) -> (i32, i32) {
    %c1_i32 = arith.constant 1 : i32
    %0 = arith.muli %arg0, %c1_i32 : i32
    %1 = arith.addi %0, %arg1 : i32
    %c0_i32 = arith.constant 0 : i32
    %c0_i32_0 = arith.constant 0 : i32
    return %1, %c0_i32 : i32, i32
  }
  func.func @transform_1(%arg0: i32, %arg1: i32) -> (i32, i32) {
    %c1_i32 = arith.constant 1 : i32
    %0 = arith.muli %arg0, %c1_i32 : i32
    %1 = arith.addi %0, %arg1 : i32
    %c0_i32 = arith.constant 0 : i32
    %c0_i32_0 = arith.constant 0 : i32
    return %1, %c0_i32 : i32, i32
  }
  func.func @transform_2(%arg0: i32, %arg1: i32) -> (i32, i32) {
    %c0_i32 = arith.constant 0 : i32
    %c0_i32_0 = arith.constant 0 : i32
    return %arg0, %c0_i32 : i32, i32
  }
}

</mosaic_0001>

<bundles_post_ra>
// kernel: tpu_custom_call.1
= control target key start
LH: loop header
LB: loop body
LE: loop exit
PB: predicated region body
PF: predicated region fallthrough
CT: control target
= control target key end

     0   :  { %7 = vsyncpa [#allocation4], 0  ;;  %s243_s0 = inlined_call_operand.hbm [shape: f32[16,128], index: 0, kind: input, shape index: {}]   ;;  %s244_s1 = inlined_call_operand.hbm [shape: f32[16,128], index: 1, kind: input, shape index: {}]   ;;  %s245_s2 = inlined_call_operand.hbm [shape: f32[1,1], index: 2, kind: output, shape index: {}]  }
   0x1   :  { %8 = vsyncpa [#allocation7], 0 }
   0x2   :  { %9 = vsyncpa [#allocation5], 0  ;;  %s214_s9 = smov [#allocation3]  }
   0x3   :  { %s19_s10 = sshll.u32 %s214_s9, 4  ;;  %s20_s10 = int_to_ptr.vmem [resolvable:$true] %s19_s10 }
   0x4   :  { %s168_s11 = scalar_lea.vmem %s20_s10, 256  ;;  %p173_p1 = scmp.lt.s32.totalorder %s20_s10, %s20_s10 }
   0x5   :  { %p169_p0 = scmp.ne.s32.totalorder %s20_s10, %s168_s11  ;;  %p174_p2 = scmp.lt.s32.totalorder %s168_s11, %s168_s11 }
   0x7   :  { %p175_p3 = por %p174_p2, %p173_p1 }
   0x9   :  { %p176_p4 = pnand %p175_p3, %p169_p0 }
   0xb   :  { %179 = shalt.err (!%p176_p4)
}
   0xc   :  { %s215_s12 = smov 128   ;;  %s216_s13 = smov 8  }
   0xd   :  { %25 = dma.hbm_to_vmem [thread:$0]  %s243_s0, 256, %s20_s10, [#allocation4], %s215_s12, %s215_s12, %s216_s13  }
   0xe   :  { %s217_s16 = smov [#allocation6]  }
   0xf   :  { %s35_s17 = sshll.u32 %s217_s16, 4  ;;  %s36_s17 = int_to_ptr.vmem [resolvable:$true] %s35_s17 }
  0x10   :  { %s188_s18 = scalar_lea.vmem %s36_s17, 256  ;;  %p193_p6 = scmp.lt.s32.totalorder %s36_s17, %s36_s17 }
  0x11   :  { %p189_p5 = scmp.ne.s32.totalorder %s36_s17, %s188_s18  ;;  %p194_p7 = scmp.lt.s32.totalorder %s188_s18, %s188_s18 }
  0x13   :  { %p195_p8 = por %p194_p7, %p193_p6 }
  0x15   :  { %p196_p9 = pnand %p195_p8, %p189_p5 }
  0x17   :  { %199 = shalt.err (!%p196_p9)
}
  0x18   :  { %41 = dma.hbm_to_vmem [thread:$0]  %s244_s1, 256, %s36_s17, [#allocation7], %s215_s12, %s215_s12, %s216_s13  }
  0x19   :  { %208 = dma.done.wait [#allocation4], 256  }
  0x1a   :  { %209 = vsyncadd [#allocation4], 4294967040 }
  0x1b   :  { %210 = dma.done.wait [#allocation7], 256  }
  0x1c   :  { %211 = vsyncadd [#allocation7], 4294967040  ;;  %v57_v0 = vld [vmem:[#allocation3] sm:$0xff]  ;;  %v58_v1 = vld [vmem:[#allocation3 + $0x8] sm:$0xff]  ;;  %s218_s1 = smov [#allocation8]  }
  0x1d   :  { %v61_v2 = vand.u32 2147483647, %v57_v0  ;;  %v62_v3 = vand.u32 2147483647, %v58_v1  ;;  %v59_v14 = vld [vmem:[#allocation6] sm:$0xff]  ;;  %v60_v15 = vld [vmem:[#allocation6 + $0x8] sm:$0xff] }
  0x1e   :  { %v69_v17 = vmax.f32 %v57_v0, 0.0  ;;  %v71_v18 = vmul.f32 %v59_v14, %v57_v0  ;;  %v70_v21 = vmax.f32 %v58_v1, 0.0  ;;  %v72_v22 = vmul.f32 %v60_v15, %v58_v1 }
  0x1f   :  { %v63_v4 = vsub.f32 0.0, %v61_v2  ;;  %v64_v5 = vsub.f32 0.0, %v62_v3 }
  0x20   :  { %v73_v26 = vsub.f32 %v69_v17, %v71_v18  ;;  %v74_v29 = vsub.f32 %v70_v21, %v72_v22 }
  0x21   :  { %v65_v6 = vmul.f32 1.442695, %v63_v4  ;;  %v67_v7 = vmul.f32 1.442695, %v64_v5 }
  0x23   :  { %148 = vpow2.f32 %v65_v6 }
  0x24   :  { %150 = vpow2.f32 %v67_v7 }
  0x30   :  { %v149_v8 = vpop.eup %148 }
  0x31   :  { %v151_v9 = vpop.eup %150  ;;  %v75_v10 = vadd.f32 1.0, %v149_v8  ;;  %v78_v12 = vmul.f32 -0.5, %v149_v8  ;;  %v81_v19 = vand.u32 2147483647, %v149_v8 }
  0x32   :  { %v84_v11 = vadd.f32 1.0, %v151_v9  ;;  %v87_v13 = vmul.f32 -0.5, %v151_v9  ;;  %v90_v23 = vand.u32 2147483647, %v151_v9 }
  0x33   :  { %152 = vlog2.f32 %v75_v10  ;;  %v79_v16 = vadd.f32 1.0, %v78_v12  ;;  %vm82_vm0 = vcmp.lt.f32.partialorder %v81_v19, 0.0004427343 }
  0x34   :  { %154 = vlog2.f32 %v84_v11  ;;  %v88_v20 = vadd.f32 1.0, %v87_v13  ;;  %vm91_vm1 = vcmp.lt.f32.partialorder %v90_v23, 0.0004427343 }
  0x35   :  { %v80_v24 = vmul.f32 %v149_v8, %v79_v16 }
  0x36   :  { %v89_v27 = vmul.f32 %v151_v9, %v88_v20 }
  0x40   :  { %v153_v25 = vpop.eup %152 }
  0x41   :  { %v155_v28 = vpop.eup %154  ;;  %v77_v30 = vmul.f32 0.6931472, %v153_v25 }
  0x42   :  { %v86_v31 = vmul.f32 0.6931472, %v155_v28 }
  0x43   :  { %v83_v32 = vsel %vm82_vm0, %v80_v24, %v77_v30 }
  0x44   :  { %v92_v33 = vsel %vm91_vm1, %v89_v27, %v86_v31  ;;  %v93_v34 = vadd.f32 %v83_v32, %v73_v26 }
  0x45   :  { %v94_v35 = vadd.f32 %v92_v33, %v74_v29 }
  0x46   :  { %v95_v36 = vsub.f32 0.0, %v93_v34 }
  0x47   :  { %v96_v37 = vsub.f32 0.0, %v94_v35 }
  0x48   :  { %v97_v38 = vmul.f32 1.442695, %v95_v36 }
  0x49   :  { %v99_v39 = vmul.f32 1.442695, %v96_v37 }
  0x4a   :  { %156 = vpow2.f32 %v97_v38 }
  0x4b   :  { %158 = vpow2.f32 %v99_v39 }
  0x57   :  { %v157_v40 = vpop.eup %156 }
  0x58   :  { %v159_v41 = vpop.eup %158  ;;  %v101_v42 = vsub.f32 1.0, %v157_v40 }
  0x59   :  { %v102_v43 = vsub.f32 1.0, %v159_v41 }
  0x5a   :  { %v103_v44 = vmul.f32 %v101_v42, %v101_v42 }
  0x5b   :  { %v104_v45 = vmul.f32 %v102_v43, %v102_v43 }
  0x5c   :  { %v105_v46 = vmul.f32 %v103_v44, %v93_v34 }
  0x5d   :  { %v106_v47 = vmul.f32 %v104_v45, %v94_v35 }
  0x5f   :  { %v108_v48 = vadd.f32 %v106_v47, %v105_v46 }
  0x61   :  { %115 = vadd.xlane.f32.xlu0 %v108_v48 }
  0xea   :  { %v116_v49 = vpop.xlane.xlu0 %115 }
  0xeb   :  { %v117_v50 = vrot.slane %v116_v49, 4 }
  0xed   :  { %v118_v51 = vadd.f32 %v117_v50, %v116_v49 }
  0xef   :  { %v119_v52 = vrot.slane %v118_v51, 2 }
  0xf1   :  { %v120_v53 = vadd.f32 %v119_v52, %v118_v51 }
  0xf3   :  { %v121_v54 = vrot.slane %v120_v53, 1 }
  0xf5   :  { %v122_v55 = vadd.f32 %v121_v54, %v120_v53 }
  0xf7   :  { %141 = vpush %v122_v55 }
 0x128   :  { %s142_s0 = spop %141 }
 0x129   :  { %125 = sst [smem:[#allocation8]] %s142_s0 }
 0x12a   :  { %133 = dma.smem_to_hbm %s218_s1, 16, %s245_s2, [#allocation5]  }
 0x12b   :  { %212 = dma.done.wait [#allocation5], 16  }
 0x12c   :  { %213 = vsyncadd [#allocation5], 4294967280 }
 0x12d   :  { %137 = sfence }
 0x12e   :  { %138 = vsyncpa [#allocation4], 1 }
 0x12f   :  { %139 = vsyncpa [#allocation7], 1 }
 0x130   :  { %140 = vsyncpa [#allocation5], 1 }

</bundles_post_ra>
